<compile_context>
chip_gen: v5e
topology: v5e:2x2
jax: 0.10.0
libtpu: 0.0.40
codegen_flags: <defaults>
</compile_context>

<pallas_src>
import jax
import jax.numpy as jnp
import numpy as np
from jax.experimental import pallas as pl
from jax.experimental.pallas import tpu as pltpu


# ----------------------------------------------------------------------------
# Reference bucket geometry (mirrors the PyTorch module).
# ----------------------------------------------------------------------------
def _reduction_params(seqs, reduce_size):
    min_window_size = seqs // reduce_size
    gap = seqs - min_window_size * reduce_size
    starting_loc = gap // 2 if gap % 2 == 0 else gap // 2 + 1
    end_loc = starting_loc + min_window_size * reduce_size
    return min_window_size, starting_loc, end_loc


def _build_pooling_matrix(seqs, reduce_size):
    """Constant (reduce_size, seqs) matrix: window means + edge 0.5-averaging."""
    mws, start, end = _reduction_params(seqs, reduce_size)
    p = np.zeros((reduce_size, seqs), dtype=np.float32)
    for i in range(reduce_size):
        p[i, start + i * mws:start + (i + 1) * mws] = 1.0 / mws
    if start > 0:  # out[0] = 0.5*window_mean(bucket0) + 0.5*mean(prefix)
        p[0, start:start + mws] = 0.5 / mws
        p[0, :start] = 0.5 / start
    if end < seqs:  # out[-1] = 0.5*window_mean(last) + 0.5*mean(suffix)
        p[reduce_size - 1, end - mws:end] = 0.5 / mws
        p[reduce_size - 1, end:] = 0.5 / (seqs - end)
    return p


def _vmem_capacity_bytes():
    """Physical VMEM per TensorCore; 64 MiB (v7x floor) if query unavailable."""
    try:
        cap = int(getattr(pltpu.get_tpu_info(), "vmem_capacity_bytes", 0))
        if cap > 0:
            return cap
    except Exception:
        pass
    return 64 << 20


# ----------------------------------------------------------------------------
# Kernel
# ----------------------------------------------------------------------------
def _make_kernel(tb, precision):
    def kernel(p_ref, x_ref, o_ref):
        # p_ref: (reduce_size, seqs)      pooling matrix (x dtype / f32)
        # x_ref: (tb, seqs, td)           input tile  (no upcast -- MXU accums f32)
        # o_ref: (tb, reduce_size, td)    output tile
        p = p_ref[...]
        for b in range(tb):  # tb is small and static -> fully unrolled dots
            o_ref[b] = jnp.dot(
                p, x_ref[b],
                preferred_element_type=jnp.float32,
                precision=precision,
            ).astype(o_ref.dtype)
    return kernel


# ----------------------------------------------------------------------------
# Wrapper
# ----------------------------------------------------------------------------
def reduction_forward(x, reduce_size=50):
    """Pallas equivalent of Reduction(reduce_size).forward(x, getstd=False)."""
    batch, seqs, dim = x.shape
    assert seqs >= reduce_size >= 1, "need at least one element per bucket"

    mws, start, end = _reduction_params(seqs, reduce_size)
    if reduce_size == 1 and start > 0 and end < seqs:
        # The torch reference itself shape-errors in this degenerate case.
        raise ValueError(
            "reduce_size == 1 with both a prefix and a suffix is undefined "
            "in the reference implementation")

    itemsize = int(np.dtype(x.dtype).itemsize)
    # Native-dtype pooling matrix for bf16 inputs (bf16 x bf16 -> f32 on MXU);
    # keep f32 P for f32 inputs.
    p_dtype = jnp.float32 if x.dtype == jnp.float32 else x.dtype
    p = jnp.asarray(_build_pooling_matrix(seqs, reduce_size), dtype=p_dtype)
    p_bytes = reduce_size * seqs * int(np.dtype(p_dtype).itemsize)

    precision = (jax.lax.Precision.HIGHEST if x.dtype == jnp.float32
                 else jax.lax.Precision.DEFAULT)

    # -------- per-generation VMEM budget (headroom for compiler scratch) ----
    cap = _vmem_capacity_bytes()                       # 64 MiB v7x / 128 MiB v5e,v6e
    budget = max(min(cap * 3 // 4, cap - (8 << 20)), 16 << 20)

    # Bytes per output lane per batch row: double-buffered input + output.
    per_lane_row = 2 * (seqs + reduce_size) * itemsize
    usable = max(budget - 2 * p_bytes, per_lane_row * 128)
    max_lanes = max(128, usable // per_lane_row)

    # Dim tile: full dim when it fits the budget, otherwise the largest
    # 128-multiple (lane-dense stores; cdiv grid masks the edge block).
    if dim <= max_lanes:
        td = dim
    else:
        td = int((max_lanes // 128) * 128)

    # Batch tile: pack several rows per step for skinny dims (bounded unroll).
    max_rows = max(1, int(max_lanes // max(td, 1)))
    tb = int(min(batch, 8, max_rows))

    num_b = pl.cdiv(batch, tb)
    num_d = pl.cdiv(dim, td)

    # Keep >= 2 grid steps along a parallel axis so both v7x cores get work.
    if num_b * num_d == 1:
        if batch >= 2:
            tb = (batch + 1) // 2
            num_b = pl.cdiv(batch, tb)
        elif dim >= 256:
            td = ((dim // 2 + 127) // 128) * 128
            num_d = pl.cdiv(dim, td)

    # -------- VMEM limit: what we actually use + margin, capped per chip ----
    used = 2 * tb * (seqs + reduce_size) * td * itemsize + 2 * p_bytes
    vmem_limit = int(min(cap - (4 << 20), max(used + (8 << 20), 32 << 20)))

    cost = pl.CostEstimate(
        flops=2 * batch * reduce_size * seqs * dim,
        transcendentals=0,
        bytes_accessed=(batch * seqs * dim + batch * reduce_size * dim) * itemsize
        + p_bytes,
    )

    return pl.pallas_call(
        _make_kernel(tb, precision),
        out_shape=jax.ShapeDtypeStruct((batch, reduce_size, dim), x.dtype),
        grid_spec=pltpu.PrefetchScalarGridSpec(
            num_scalar_prefetch=0,
            grid=(num_b, num_d),
            in_specs=[
                pl.BlockSpec((reduce_size, seqs), lambda b, d: (0, 0)),
                pl.BlockSpec((tb, seqs, td), lambda b, d: (b, 0, d)),
            ],
            out_specs=pl.BlockSpec((tb, reduce_size, td), lambda b, d: (b, 0, d)),
        ),
        compiler_params=pltpu.CompilerParams(
            dimension_semantics=("parallel", "parallel"),
            vmem_limit_bytes=vmem_limit,
        ),
        cost_estimate=cost,
    )(p, x)


# ----------------------------------------------------------------------------
# Pure-JAX mirror of the PyTorch forward (getstd=False), for checking.
# ----------------------------------------------------------------------------
def reduction_ref(x, reduce_size):
    batch, seqs, dim = x.shape
    x = x.astype(jnp.float32)
    mws, starting_loc, end_loc = _reduction_params(seqs, reduce_size)
    xmid = x[:, starting_loc:end_loc]
    xmr = jnp.mean(xmid.reshape(batch, reduce_size, mws, dim), axis=2)
    pieces = []
    if starting_loc > 0:
        pieces.append(jnp.mean(x[:, :starting_loc], axis=1, keepdims=True))
    lo = 0 if starting_loc == 0 else 1
    hi = reduce_size if end_loc == seqs else reduce_size - 1
    pieces.append(xmr[:, lo:hi])
    if end_loc < seqs:
        pieces.append(jnp.mean(x[:, end_loc:], axis=1, keepdims=True))
    xcrr = jnp.concatenate(pieces, axis=1)
    return (xmr + xcrr) / 2


if __name__ == "__main__":
    key = jax.random.PRNGKey(0)

    # (batch, seqs, dim, reduce_size, dtype, atol): cover odd gap (both edges),
    # gap=1 (prefix only), gap=0 (no edges), wide dim (full-dim tile + batch
    # split), and a bf16 case exercising the native bf16 MXU path.
    cases = [
        (2, 35, 32, 8, jnp.float32, 1e-5),
        (2, 33, 32, 8, jnp.float32, 1e-5),
        (2, 32, 32, 8, jnp.float32, 1e-5),
        (2, 203, 1024, 50, jnp.float32, 1e-5),   # mws=4, prefix=2, suffix=1
        (2, 203, 1024, 50, jnp.bfloat16, 3e-2),
    ]
    for batch, seqs, dim, reduce_size, dtype, atol in cases:
        key, sub = jax.random.split(key)
        x = jax.random.normal(sub, (batch, seqs, dim), dtype=jnp.float32).astype(dtype)
        out = jax.block_until_ready(reduction_forward(x, reduce_size=reduce_size))
        ref = reduction_ref(x, reduce_size)
        assert out.shape == (batch, reduce_size, dim), out.shape
        assert jnp.allclose(out.astype(jnp.float32), ref, atol=atol, rtol=atol), (
            f"mismatch for shape {(batch, seqs, dim)} reduce_size={reduce_size} "
            f"dtype={dtype}")

    print("KERNEL_OK")
</pallas_src>

<mosaic_0001>
module attributes {stable_mosaic.version = 11 : i64} {
  func.func @kernel(%arg0: i32, %arg1: i32, %arg2: memref<8x35xf32, #tpu.memory_space<vmem>>, %arg3: memref<1x35x32xf32, #tpu.memory_space<vmem>>, %arg4: memref<1x8x32xf32, #tpu.memory_space<vmem>>) attributes {dimension_semantics = [#tpu.dimension_semantics<parallel>, #tpu.dimension_semantics<parallel>], iteration_bounds = array<i64: 2, 1>, scalar_prefetch = 0 : i64, scratch_operands = 0 : i64, tpu.core_type = #tpu.core_type<tc>, window_params = [{pipeline_mode = #tpu.pipeline_mode<synchronous>, transform_indices = @transform_0, window_bounds = array<i64: 8, 35>}, {transform_indices = @transform_1, window_bounds = array<i64: 1, 35, 32>}, {transform_indices = @transform_2, window_bounds = array<i64: 1, 8, 32>}]} {
    %c0 = arith.constant 0 : index
    %c0_0 = arith.constant 0 : index
    %0 = vector.load %arg2[%c0, %c0_0] : memref<8x35xf32, #tpu.memory_space<vmem>>, vector<8x35xf32>
    %c0_1 = arith.constant 0 : index
    %c0_2 = arith.constant 0 : index
    %c0_3 = arith.constant 0 : index
    %1 = vector.load %arg3[%c0_1, %c0_2, %c0_3] : memref<1x35x32xf32, #tpu.memory_space<vmem>>, vector<1x35x32xf32>
    %2 = vector.shape_cast %1 : vector<1x35x32xf32> to vector<35x32xf32>
    %cst = arith.constant dense<0.000000e+00> : vector<8x32xf32>
    %3 = tpu.matmul %0, %2, %cst {dimension_numbers = #tpu.dot_dimension_numbers<[1], [0], [0], [1], [0, 0, 1, 1], [], []>, precision = #tpu.contract_precision<fp32>} : vector<8x35xf32>, vector<35x32xf32>, vector<8x32xf32> -> vector<8x32xf32>
    %c0_4 = arith.constant 0 : index
    %c0_5 = arith.constant 0 : index
    %c0_6 = arith.constant 0 : index
    %4 = vector.load %arg4[%c0_4, %c0_5, %c0_6] : memref<1x8x32xf32, #tpu.memory_space<vmem>>, vector<1x8x32xf32>
    %5 = vector.shape_cast %4 : vector<1x8x32xf32> to vector<8x32xf32>
    %6 = vector.shape_cast %3 : vector<8x32xf32> to vector<1x8x32xf32>
    tpu.vector_store %arg4[%c0_4, %c0_5, %c0_6], %6 {strides = array<i32>} : memref<1x8x32xf32, #tpu.memory_space<vmem>>, vector<1x8x32xf32>,
    return
  }
  func.func @transform_0(%arg0: i32, %arg1: i32) -> (i32, i32) {
    %c0_i32 = arith.constant 0 : i32
    %c0_i32_0 = arith.constant 0 : i32
    %c0_i32_1 = arith.constant 0 : i32
    return %c0_i32, %c0_i32_0 : i32, i32
  }
  func.func @transform_1(%arg0: i32, %arg1: i32) -> (i32, i32, i32) {
    %c0_i32 = arith.constant 0 : i32
    %c0_i32_0 = arith.constant 0 : i32
    return %arg0, %c0_i32, %arg1 : i32, i32, i32
  }
  func.func @transform_2(%arg0: i32, %arg1: i32) -> (i32, i32, i32) {
    %c0_i32 = arith.constant 0 : i32
    %c0_i32_0 = arith.constant 0 : i32
    return %arg0, %c0_i32, %arg1 : i32, i32, i32
  }
}

</mosaic_0001>

<bundles_post_ra>
// kernel: tpu_custom_call.1
= control target key start
LH: loop header
LB: loop body
LE: loop exit
PB: predicated region body
PF: predicated region fallthrough
CT: control target
= control target key end

     0   :  { %7 = vsyncpa [#allocation3], 0  ;;  %s740_s0 = inlined_call_operand.vmem [shape: f32[8,35], index: 0, kind: input, shape index: {}]   ;;  %s741_s1 = inlined_call_operand.vmem [shape: f32[2,35,32], index: 1, kind: input, shape index: {}]   ;;  %s742_s2 = inlined_call_operand.hbm [shape: f32[2,8,32], index: 2, kind: output, shape index: {}]  }
   0x1   :  { %9 = vsyncpa [#allocation3 + $0x1], 0  ;;  %s634_s9 = smov 0   ;;  %s636_s10 = smov 0  }
   0x2   :  { %s638_s11 = smov 0   ;;  %s640_s12 = smov 0  }
   0x3   :  { %s642_s13 = smov 0   ;;  %s644_s14 = smov 0  }
   0x4 LB: > { %s472_s15 = sadd.s32 4294967295, %s617_s14   ;;  %s473_s16 = sadd.s32 4294967294, %s617_s14   ;;  %s617_s14 = sphi %s644_s14, %s15_s14   ;;  %s613_s13 = sphi %s642_s13, %s749_s13   ;;  %s609_s12 = sphi %s640_s12, %s748_s12   ;;  %s605_s11 = sphi %s638_s11, %s747_s11   ;;  %s601_s10 = sphi %s636_s10, %s746_s10   ;;  %s597_s9 = sphi %s634_s9, %s745_s9  }
   0x5   : > { %s27_s17 = sadd.s32 1, %s613_s13  ;;  %s85_s18 = sadd.s32 1, %s605_s11 }
   0x6   : > { %p29_p0 = scmp.ge.s32.totalorder %s27_s17, 2  ;;  %p95_p1 = scmp.ne.s32.totalorder %s605_s11, %s601_s10 }
   0x7   : > { %p96_p2 = scmp.eq.s32.totalorder %s472_s15, 1  ;;  %p101_p3 = scmp.ne.s32.totalorder %s601_s10, %s597_s9 }
   0x8   : > { %s751_s17 = smov (%p29_p0, %s27_s17), 0  ;;  %p102_p5 = scmp.eq.s32.totalorder %s473_s16, 1 }
   0x9   : > { %p674_p4 = por %p96_p2, %p95_p1  ;;  %s80_s20 = ssub.s32 %s613_s13, %s751_s17 }
   0xa   : > { %p476_p6 = scmp.ge.s32.totalorder %s617_s14, 1  ;;  %p83_p7 = scmp.eq.s32.totalorder %s80_s20, 0 }
   0xb   : > { %p681_p8 = por %p102_p5, %p101_p3  ;;  %p134_p9 = scmp.lt.s32.totalorder %s617_s14, 3 }
   0xc   : > { %s687_s22 = scalar_select %p83_p7, %s605_s11, %s85_s18  }
   0xd   : > { %p135_p10 = pnand %p476_p6, %p134_p9 }
   0xe   : > { %p159_p11 = scmp.lt.s32.totalorder (!%p135_p10), %s609_s12, 1  ;;  %s156_s30 = sand.u32 (!%p135_p10), 1, %s601_s10  }
   0xf   : > { %138 = sbr.rel (%p135_p10) target bundleno = 187 (0xbb), region = 28  ;;  %s477_s3 = sshll.u32 (!%p135_p10), %s156_s30, 3 }
  0x10   : > { %s480_s4 = sshll.u32 (!%p135_p10), %s609_s12, 3  ;;  %s158_s8 = scalar_lea.vmem (!%p135_p10), [#allocation2], %s477_s3 }
  0x11   : > { %s393_s7 = scalar_lea.hbm (!%p135_p10), %s742_s2, %s480_s4  ;;  %s395_s15 = sshll.u32 (!%p135_p10), %s158_s8, 4  ;;  %s396_s15 = int_to_ptr.vmem [resolvable:$true] %s395_s15 }
  0x12   : > { %s397_s16 = sshll.u32 (!%p135_p10), %s393_s7, 4  ;;  %s382_s18 = scalar_lea.sflag (!%p135_p10), [#allocation3], %s156_s30  ;;  %s398_s16 = int_to_ptr.hbm [resolvable:$true] %s397_s16 }
  0x14   : > { %v167_v0 = vld [vmem:[%s740_s0] sm:$0xff]  ;;  %vm173_vm0 = vcmask 285696   ;;  %s160_s25 = scalar_select %p159_p11, %s609_s12, 1  ;;  %vm177_vm1 = vcmask 1042432   ;;  %vm379_vm2 = vcmask 261120  }
  0x15   : > { %v175_v1 = vsel %vm173_vm0, %v167_v0, 0  ;;  %s553_s12 = sshra.s32 %s398_s16, 4  ;;  %s554_s12 = int_to_ptr.hbm [resolvable:$true] %s553_s12 }
  0x16   : > { %v694_v2 = vand.u32 4294901760, %v175_v1  ;;  %s483_s26 = smul.u32 40, %s160_s25  ;;  %s555_s20 = scalar_lea.hbm %s554_s12, 8 }
  0x17   : > { %p556_p12 = scmp.ne.s32.totalorder %s554_s12, %s555_s20  ;;  %s559_s25 = scalar_lea.hbm %s742_s2, 16 }
  0x18   : > { %s166_s29 = scalar_lea.vmem %s741_s1, %s483_s26  ;;  %v203_v6 = vsub.f32 %v175_v1, %v694_v2  ;;  %p560_p1 = scmp.lt.s32.totalorder %s554_s12, %s742_s2 }
  0x19   : > { %v172_v3 = vld [vmem:[%s166_s29 + $0x20] sm:$0x7]  ;;  %v171_v4 = vld [vmem:[%s166_s29 + $0x18] sm:$0xff]  ;;  %v170_v5 = vld [vmem:[%s166_s29 + $0x10] sm:$0xff]  ;;  %p557_p13 = pnand %p556_p12, %p674_p4  ;;  %p561_p2 = scmp.lt.s32.totalorder %s559_s25, %s555_s20 }
  0x1a   : > { %v179_v7 = vsel %vm177_vm1, %v172_v3, 0  ;;  %v194_v8 = vand.u32 4294901760, %v171_v4  ;;  %v196_v9 = vand.u32 4294901760, %v170_v5  ;;  %v169_v10 = vld [vmem:[%s166_s29 + $0x8] sm:$0xff]  ;;  %v168_v11 = vld [vmem:[%s166_s29] sm:$0xff]  ;;  %v204_v20 = vand.u32 4294901760, %v203_v6 }
  0x1b   : > { %v192_v12 = vand.u32 4294901760, %v179_v7  ;;  %v198_v13 = vand.u32 4294901760, %v169_v10  ;;  %v200_v14 = vand.u32 4294901760, %v168_v11  ;;  %p558_p0 = pneg %p557_p13  ;;  %p562_p3 = por %p561_p2, %p560_p1 }
  0x1c   : > { %v229_v15 = vsub.f32 %v171_v4, %v194_v8  ;;  %v235_v16 = vsub.f32 %v170_v5, %v196_v9  ;;  %v205_v28 = vsub.f32 %v203_v6, %v204_v20 }
  0x1d   : > { %v223_v17 = vsub.f32 %v179_v7, %v192_v12  ;;  %193 = vmatpush.msra.mxu0 %v192_v12  ;;  %301 = vmatpush.msra.mxu3 %v192_v12  ;;  %v241_v18 = vsub.f32 %v169_v10, %v198_v13  ;;  %v247_v19 = vsub.f32 %v168_v11, %v200_v14  ;;  %p563_p5 = pnand %p562_p3, %p558_p0 }
  0x1e   : > { %v230_v21 = vand.u32 4294901760, %v229_v15  ;;  %v236_v22 = vand.u32 4294901760, %v235_v16  ;;  %v206_v34 = vand.u32 4294901760, %v205_v28 }
  0x1f   : > { %270 = vmatpush.msra.mxu2 %v223_v17  ;;  %195 = vmatpush.msra.mxu0 %v194_v8  ;;  %v224_v23 = vand.u32 4294901760, %v223_v17  ;;  %v242_v24 = vand.u32 4294901760, %v241_v18  ;;  %v248_v29 = vand.u32 4294901760, %v247_v19 }
  0x20   : > { %303 = vmatpush.msra.mxu3 %v194_v8  ;;  %v231_v25 = vsub.f32 %v229_v15, %v230_v21  ;;  %v237_v27 = vsub.f32 %v235_v16, %v236_v22 }
  0x21   : > { %273 = vmatpush.msra.mxu2 %v229_v15  ;;  %v225_v26 = vsub.f32 %v223_v17, %v224_v23  ;;  %197 = vmatpush.msra.mxu0 %v196_v9  ;;  %v243_v32 = vsub.f32 %v241_v18, %v242_v24  ;;  %v249_v35 = vsub.f32 %v247_v19, %v248_v29 }
  0x22   : > { %305 = vmatpush.msra.mxu3 %v196_v9  ;;  %v232_v31 = vand.u32 4294901760, %v231_v25  ;;  %v238_v33 = vand.u32 4294901760, %v237_v27 }
  0x23   : > { %v226_v30 = vand.u32 4294901760, %v225_v26  ;;  %276 = vmatpush.msra.mxu2 %v235_v16  ;;  %199 = vmatpush.msra.mxu0 %v198_v13  ;;  %v244_v36 = vand.u32 4294901760, %v243_v32  ;;  %v250_v37 = vand.u32 4294901760, %v249_v35 }
  0x24   : > { %307 = vmatpush.msra.mxu3 %v198_v13 }
  0x25   : > { %227 = vmatpush.msra.mxu1 %v226_v30  ;;  %279 = vmatpush.msra.mxu2 %v241_v18 }
  0x26   : > { %201 = vmatpush.msra.mxu0 %v200_v14  ;;  %309 = vmatpush.msra.mxu3 %v200_v14 }
  0x27   : > { %233 = vmatpush.msra.mxu1 %v232_v31  ;;  %282 = vmatpush.msra.mxu2 %v247_v19 }
  0x28   : > { %285 = vmatmul.f32.vlgmr.msra.gmra.mxu2 %v203_v6  ;;  %331 = vmatpush.msrb.mxu0 %v224_v23 }
  0x29   : > { %239 = vmatpush.msra.mxu1 %v238_v33  ;;  %207 = vmatmul.f32.vlgmr.msra.gmra.mxu0 %v206_v34 }
  0x2a   : > { %313 = vmatmul.f32.vlgmr.msra.gmra.mxu3 %v204_v20  ;;  %335 = vmatpush.msrb.mxu0 %v230_v21 }
  0x2b   : > { %245 = vmatpush.msra.mxu1 %v244_v36 }
  0x2c   : > { %339 = vmatpush.msrb.mxu0 %v236_v22 }
  0x2d   : > { %251 = vmatpush.msra.mxu1 %v250_v37 }
  0x2e   : > { %253 = vmatmul.f32.vlgmr.msra.gmra.mxu1 %v694_v2  ;;  %343 = vmatpush.msrb.mxu0 %v242_v24 }
  0x2f   : > { %365 = vmatpush.msrb.mxu1 %v192_v12 }
  0x30   : > { %347 = vmatpush.msrb.mxu0 %v248_v29 }
  0x31   : > { %367 = vmatpush.msrb.mxu1 %v194_v8  ;;  %349 = vmatmul.f32.vlgmr.msrb.gmra.mxu0 %v694_v2 }
  0x33   : > { %369 = vmatpush.msrb.mxu1 %v196_v9 }
  0x35   : > { %371 = vmatpush.msrb.mxu1 %v198_v13 }
  0x37   : > { %373 = vmatpush.msrb.mxu1 %v200_v14 }
  0x38   : > { %375 = vmatmul.f32.vlgmr.msrb.gmra.mxu1 %v694_v2 }
  0xa6   : > { %v208_v38 = vpop.f32.mrf.mxu0 }
  0xab   : > { %v254_v39 = vpop.f32.mrf.mxu1  ;;  %v286_v40 = vpop.f32.mrf.mxu2 }
  0xac   : > { %v255_v41 = vadd.f32 %v254_v39, %v208_v38 }
  0xad   : > { %v314_v42 = vpop.f32.mrf.mxu3 }
  0xae   : > { %v287_v43 = vadd.f32 %v286_v40, %v255_v41  ;;  %v350_v44 = vpop.f32.mrf.mxu0 }
  0xb0   : > { %v315_v45 = vadd.f32 %v314_v42, %v287_v43 }
  0xb2   : > { %v351_v46 = vadd.f32 %v350_v44, %v315_v45 }
  0xb5   : > { %v376_v47 = vpop.f32.mrf.mxu1 }
  0xb6   : > { %v377_v48 = vadd.f32 %v376_v47, %v351_v46 }
  0xb8   : > { %380 = vst.msk [vmem:[%s158_s8] sm:$0xff] %vm379_vm2, %v377_v48 }
  0xb9   : > { %566 = shalt.err (!%p563_p5)
}
  0xba   : > { %484 = dma.vmem_to_hbm [thread:$0]  (%p674_p4), %s396_s15, 128, %s398_s16, %s382_s18  }
  0xbb PF: > { %p490_p6 = scmp.ge.s32.totalorder %s617_s14, 2  ;;  %s409_s28 = sand.u32 1, %s597_s9  }
  0xbc   : > { %s410_s29 = scalar_lea.sflag [#allocation3], %s409_s28 }
  0xbd   : > { %p487_p7 = pnand %p490_p6, %p681_p8 }
  0xbf   : > { %p488_p9 = pneg %p487_p7 }
  0xc1   : > { %592 = dma.done.wait (%p488_p9), %s410_s29, 128  }
  0xc2   : > { %594 = vsyncadd (%p488_p9), %s410_s29, 4294967168  ;;  %s15_s14 = sadd.s32 1, %s617_s14   ;;  %s745_s9 = smov %s601_s10 }
  0xc3   : > { %p12_p10 = scmp.ge.s32.totalorder %s15_s14, 4   ;;  %s746_s10 = smov %s605_s11 }
  0xc4   : > { %s747_s11 = smov %s687_s22  ;;  %s748_s12 = smov %s613_s13 }
  0xc5   : > { %s749_s13 = smov %s751_s17  ;;  %14 = sbr.rel (!%p12_p10) target bundleno = 4 (0x4), region = 63 }
  0xca   :  { %416 = vsyncpa [#allocation3], 1 }
  0xcb   :  { %418 = vsyncpa [#allocation3 + $0x1], 1 }

</bundles_post_ra>
